<compile_context>
chip_gen: v6e
topology: v6e:2x2x1
jax: 0.10.0
libtpu: 0.0.40
codegen_flags: <defaults>
</compile_context>

<pallas_src>
import numpy as np
import jax
import jax.numpy as jnp
from jax import lax
from jax.experimental import pallas as pl
from jax.experimental.pallas import tpu as pltpu

LANE = 128


# ------------------------------ Pallas kernel ------------------------------ #

def make_fused_kernel(Hp1, Hp2):
    """Builds the per-image kernel.  Hp1 = H//2 (pool-1 rows), Hp2 = H//4."""
    Hq = Hp1 // 2
    assert Hq == Hp2

    def kernel(xs_ref, bconv_ref, wfc_ref, bias_ref, out_ref, p1s_ref):
        f32 = jnp.float32
        bf16 = jnp.bfloat16

        def pool_bias_relu(z_even, z_odd, bias_row):
            m = jnp.maximum(z_even, z_odd)                 # max-pool over h (row pairs)
            m = jnp.maximum(m[:, :LANE], m[:, LANE:])      # max-pool over w (aligned 128 blocks)
            return jnp.maximum(m + bias_row, 0.0)          # bias + ReLU (order-equivalent)

        # ----------------- conv1 + ReLU + maxpool (one matmul) ----------------
        # xs_ref: (2*Hp1, 3*128) bf16.  Rows 0..Hp1-1 = even conv rows, rows
        # Hp1.. = odd conv rows, both in pool-row order [1,3,...,0,2,...];
        # lanes = 3 h-taps of 128 (w*Cin + c, zero padded).
        z1 = jnp.dot(xs_ref[...], bconv_ref[0], preferred_element_type=f32)   # (2*Hp1, 256)
        p1 = pool_bias_relu(z1[0:Hp1], z1[Hp1:2 * Hp1], bias_ref[0:1, :])      # (Hp1, 128)

        # ----------------- conv2 staging via VMEM scratch ----------------------
        # scratch rows become [0, p1_odd..., p1_even..., 0] (p1 is already in
        # odd-then-even pool-row order), so the four shifted stride-2 windows
        # of the zero-padded input are contiguous slices.
        zrow = jnp.zeros((1, LANE), f32)
        p1s_ref[0:1, :] = zrow
        p1s_ref[Hp1 + 1:Hp1 + 2, :] = zrow
        p1s_ref[1:Hp1 + 1, :] = p1
        t0 = p1s_ref[0:Hq, :]                     # padded-p1 rows 2*r2   (tap kh=0, even rows)
        t2 = p1s_ref[1:1 + Hq, :]                 # padded-p1 rows 2*r2+2
        t1 = p1s_ref[1 + Hq:1 + 2 * Hq, :]        # padded-p1 rows 2*r2+1
        t3 = p1s_ref[2 + Hq:2 + 2 * Hq, :]        # padded-p1 rows 2*r2+3
        staged_e = jnp.concatenate([t0, t1, t2], axis=1).astype(bf16)   # (Hq, 384)
        staged_o = jnp.concatenate([t1, t2, t3], axis=1).astype(bf16)   # (Hq, 384)

        b2 = bconv_ref[1]
        z2e = jnp.dot(staged_e, b2, preferred_element_type=f32)          # (Hq, 256)
        z2o = jnp.dot(staged_o, b2, preferred_element_type=f32)
        p2 = pool_bias_relu(z2e, z2o, bias_ref[1:2, :])                  # (Hp2, 128)

        # TODO(synk): nn.Dropout2d(p=0.2) is applied as eval-mode identity (no RNG masking).

        # ----------------- fc + log_softmax ------------------------------------
        # wfc columns are Hp2 blocks of 128 lanes (classes in the first ncls
        # lanes of each block); the h-diagonal fold is a sum of aligned slices.
        t = jnp.dot(p2.astype(bf16), wfc_ref[...], preferred_element_type=f32)  # (Hp2, Hp2*128)
        row = t[0:1, 0:LANE]
        for h in range(1, Hp2):
            row = row + t[h:h + 1, h * LANE:(h + 1) * LANE]
        logits = row + bias_ref[2:3, :]            # real logits in lanes < ncls, -1e30 elsewhere
        zmax = jnp.max(logits, axis=-1, keepdims=True)
        z = logits - zmax
        lse = jnp.log(jnp.sum(jnp.exp(z), axis=-1, keepdims=True))
        out_ref[...] = jnp.broadcast_to(z - lse, out_ref.shape).astype(out_ref.dtype)

    return kernel


# --------------------- one-time parameter preparation ---------------------- #

def prepare_params(params, H, W):
    """Converts PyTorch-layout weights into batch-independent kernel constants."""
    w1, b1, w2, b2, wf, bfc = params
    C1 = w1.shape[0]
    C2 = w2.shape[0]
    ncls = wf.shape[0]
    Hp1, Wp1 = H // 2, W // 2
    Hp2, Wp2 = Hp1 // 2, Wp1 // 2

    def conv_band(w_oihw, b, Win):
        Cout, Ci, KH, KW = w_oihw.shape
        assert Win * Ci <= LANE and (Win // 2) * Cout <= LANE
        # Toeplitz-along-W ("banded") weights:
        #   Bnat[kh, wi*Ci+c, wo*Cout+co] = w[co, c, kh, wi-wo+1]  (zero outside band)
        S = np.stack([np.eye(Win, Win, 1 - kw, dtype=np.float32) for kw in range(KW)])
        wk = jnp.transpose(w_oihw, (2, 3, 1, 0))                       # (kh, kw, Ci, Cout)
        Bnat = jnp.einsum('kio,hkcd->hicod', jnp.asarray(S), wk)
        Bnat = Bnat.reshape(KH, Win * Ci, Win * Cout)
        # split output columns into even-w / odd-w 128-lane blocks (for the 2x2 w-pool)
        idx = np.arange(Win * Cout).reshape(Win, Cout)
        half = (Win // 2) * Cout

        def block(cols):
            m = Bnat[:, :, cols.reshape(-1)]
            return jnp.pad(m, ((0, 0), (0, 0), (0, LANE - half)))

        Bsplit = jnp.concatenate([block(idx[0::2]), block(idx[1::2])], axis=-1)  # (KH, Win*Ci, 256)
        # pad per-tap input lanes to 128 and stack the KH taps along the K dimension
        Bsplit = jnp.pad(Bsplit, ((0, 0), (0, LANE - Win * Ci), (0, 0)))         # (KH, 128, 256)
        Bstk = Bsplit.reshape(KH * LANE, 2 * LANE)                               # (384, 256)
        bias_row = jnp.pad(jnp.tile(b, Win // 2), (0, LANE - half))              # (128,)
        return Bstk, bias_row

    B1, bias1 = conv_band(w1, b1, W)
    B2, bias2 = conv_band(w2, b2, Wp1)
    bconv = jnp.stack([B1, B2]).astype(jnp.bfloat16)                    # (2, 384, 256)

    # FC weights: rows = p2 lanes (w2*C2 + c2), cols = h*128 + class (PyTorch
    # flatten order is (c, h, w)).
    assert Wp2 * C2 <= LANE and ncls <= LANE
    wf4 = wf.reshape(ncls, C2, Hp2, Wp2)
    wcat = jnp.transpose(wf4, (3, 1, 2, 0)).reshape(Wp2 * C2, Hp2, ncls)
    wcat = jnp.pad(wcat, ((0, LANE - Wp2 * C2), (0, 0), (0, LANE - ncls)))
    wcat = wcat.reshape(LANE, Hp2 * LANE).astype(jnp.bfloat16)          # (128, Hp2*128)

    fc_row = jnp.concatenate([bfc.astype(jnp.float32),
                              jnp.full((LANE - ncls,), -1e30, jnp.float32)])
    bias_tbl = jnp.stack([bias1, bias2, fc_row]).astype(jnp.float32)    # (3, 128)
    return bconv, wcat, bias_tbl


# --------------------------- input layout staging --------------------------- #

def stage_input(x_nchw):
    """(N,C,H,W) -> (N, 2*(H//2), 3*128) bf16.

    Pure layout plumbing (pad + row gather, no arithmetic): rows 0..Hp1-1 hold
    the 3 h-taps of the even conv rows, rows Hp1.. the odd conv rows, both in
    pool-row order [1,3,...,0,2,...] so the kernel's conv2 staging needs only
    contiguous slices.  Lanes = 3 taps x (w*C + c, zero padded to 128).
    """
    N, C, H, W = x_nchw.shape
    assert W * C <= LANE
    Hp1 = H // 2
    x = jnp.transpose(x_nchw, (0, 2, 3, 1)).reshape(N, H, W * C)        # lanes = w*C + c
    xpad = jnp.pad(x, ((0, 0), (1, 1), (0, LANE - W * C)))              # (N, H+2, 128)
    perm = np.concatenate([np.arange(1, Hp1, 2), np.arange(0, Hp1, 2)])
    rows = np.concatenate([2 * perm, 2 * perm + 1])                     # (2*Hp1,)
    taps = rows[:, None] + np.arange(3)[None, :]                        # (2*Hp1, 3)
    staged = xpad[:, taps, :]                                           # (N, 2*Hp1, 3, 128)
    return staged.reshape(N, 2 * Hp1, 3 * LANE).astype(jnp.bfloat16)


# ------------------------------ forward (JAX) ------------------------------ #

def forward(x_nchw, prep, num_classes):
    bconv, wcat, bias_tbl = prep
    N, C, H, W = x_nchw.shape
    Hp1, Hp2 = H // 2, H // 4
    staged = stage_input(x_nchw)                                        # (N, 2*Hp1, 384)
    kernel = make_fused_kernel(Hp1, Hp2)

    out = pl.pallas_call(
        kernel,
        out_shape=jax.ShapeDtypeStruct((N, 8, LANE), jnp.float32),
        grid=(N,),
        in_specs=[
            pl.BlockSpec((None, 2 * Hp1, 3 * LANE), lambda n: (n, 0, 0)),
            pl.BlockSpec(bconv.shape, lambda n: (0, 0, 0)),
            pl.BlockSpec(wcat.shape, lambda n: (0, 0)),
            pl.BlockSpec(bias_tbl.shape, lambda n: (0, 0)),
        ],
        out_specs=pl.BlockSpec((None, 8, LANE), lambda n: (n, 0, 0)),
        scratch_shapes=[pltpu.VMEM((16, LANE), jnp.float32)],
        compiler_params=pltpu.CompilerParams(dimension_semantics=("parallel",)),
    )(staged, bconv, wcat, bias_tbl)
    return out[:, 0, :num_classes]


# -------------------------- pure-JAX reference ----------------------------- #

def reference_forward(x, params):
    w1, b1, w2, b2, wf, bfc = params
    hi = lax.Precision.HIGHEST

    def conv_relu_pool(y, w, b):
        y = lax.conv_general_dilated(
            y, w, window_strides=(1, 1), padding='SAME',
            dimension_numbers=('NCHW', 'OIHW', 'NCHW'), precision=hi)
        y = jnp.maximum(y + b[None, :, None, None], 0.0)
        return lax.reduce_window(y, -jnp.inf, lax.max,
                                 (1, 1, 2, 2), (1, 1, 2, 2), 'VALID')

    y = conv_relu_pool(x, w1, b1)
    y = conv_relu_pool(y, w2, b2)
    feat = y.reshape(x.shape[0], -1)                  # NCHW flatten order
    logits = jnp.dot(feat, wf.T, precision=hi) + bfc
    return jax.nn.log_softmax(logits, axis=-1)


# ---------------------------------- main ------------------------------------ #

if __name__ == "__main__":
    key = jax.random.PRNGKey(0)
    kx, kp = jax.random.split(key)

    N, Cin, H, W = 2, 3, 16, 16
    num_classes = 3
    x = jax.random.normal(kx, (N, Cin, H, W), jnp.float32)

    flattened_size = 24 * (H // 4) * (W // 4)          # 24 * 4 * 4 = 384
    ks = jax.random.split(kp, 6)
    w1 = jax.random.normal(ks[0], (12, 3, 3, 3), jnp.float32) * 0.1     # Conv2d(3,12,3)
    b1 = jax.random.normal(ks[1], (12,), jnp.float32) * 0.1
    w2 = jax.random.normal(ks[2], (24, 12, 3, 3), jnp.float32) * 0.1    # Conv2d(12,24,3)
    b2 = jax.random.normal(ks[3], (24,), jnp.float32) * 0.1
    wf = jax.random.normal(ks[4], (num_classes, flattened_size), jnp.float32) * 0.05
    bfc = jax.random.normal(ks[5], (num_classes,), jnp.float32) * 0.05
    params = (w1, b1, w2, b2, wf, bfc)

    prep = prepare_params(params, H, W)                # one-time weight prep
    fwd = jax.jit(forward, static_argnums=2)
    out = jax.block_until_ready(fwd(x, prep, num_classes))

    assert out.shape == (N, num_classes)
    assert bool(jnp.all(jnp.isfinite(out)))

    ref = jax.block_until_ready(reference_forward(x, params))
    max_err = float(jnp.max(jnp.abs(out - ref)))
    assert max_err < 5e-2, f"kernel/reference mismatch: max abs err = {max_err}"
    print("KERNEL_OK")
</pallas_src>

<mosaic_0001>
module attributes {stable_mosaic.version = 11 : i64} {
  func.func @kernel(%arg0: i32, %arg1: memref<1x16x384xbf16, #tpu.memory_space<vmem>>, %arg2: memref<2x384x256xbf16, #tpu.memory_space<vmem>>, %arg3: memref<128x512xbf16, #tpu.memory_space<vmem>>, %arg4: memref<3x128xf32, #tpu.memory_space<vmem>>, %arg5: memref<1x8x128xf32, #tpu.memory_space<vmem>>, %arg6: memref<16x128xf32, #tpu.memory_space<vmem>>) attributes {dimension_semantics = [#tpu.dimension_semantics<parallel>], iteration_bounds = array<i64: 2>, scalar_prefetch = 0 : i64, scratch_operands = 1 : i64, tpu.core_type = #tpu.core_type<tc>, window_params = [{transform_indices = @transform_0, window_bounds = array<i64: 1, 16, 384>}, {pipeline_mode = #tpu.pipeline_mode<synchronous>, transform_indices = @transform_1, window_bounds = array<i64: 2, 384, 256>}, {pipeline_mode = #tpu.pipeline_mode<synchronous>, transform_indices = @transform_2, window_bounds = array<i64: 128, 512>}, {pipeline_mode = #tpu.pipeline_mode<synchronous>, transform_indices = @transform_3, window_bounds = array<i64: 3, 128>}, {transform_indices = @transform_4, window_bounds = array<i64: 1, 8, 128>}]} {
    %c0 = arith.constant 0 : index
    %c0_0 = arith.constant 0 : index
    %c0_1 = arith.constant 0 : index
    %0 = vector.load %arg1[%c0, %c0_0, %c0_1] : memref<1x16x384xbf16, #tpu.memory_space<vmem>>, vector<1x16x384xbf16>
    %1 = vector.shape_cast %0 : vector<1x16x384xbf16> to vector<16x384xbf16>
    %c0_2 = arith.constant 0 : index
    %c0_3 = arith.constant 0 : index
    %c0_4 = arith.constant 0 : index
    %2 = vector.load %arg2[%c0_2, %c0_3, %c0_4] : memref<2x384x256xbf16, #tpu.memory_space<vmem>>, vector<1x384x256xbf16>
    %3 = vector.shape_cast %2 : vector<1x384x256xbf16> to vector<384x256xbf16>
    %cst = arith.constant dense<0.000000e+00> : vector<16x256xf32>
    %4 = tpu.matmul %1, %3, %cst {dimension_numbers = #tpu.dot_dimension_numbers<[1], [0], [0], [1], [0, 0, 1, 1], [], []>} : vector<16x384xbf16>, vector<384x256xbf16>, vector<16x256xf32> -> vector<16x256xf32>
    %5 = vector.extract_strided_slice %4 {offsets = [0, 0], sizes = [8, 256], strides = [1, 1]} : vector<16x256xf32> to vector<8x256xf32>
    %6 = vector.extract_strided_slice %4 {offsets = [8, 0], sizes = [8, 256], strides = [1, 1]} : vector<16x256xf32> to vector<8x256xf32>
    %c0_5 = arith.constant 0 : index
    %c0_6 = arith.constant 0 : index
    %7 = vector.load %arg4[%c0_5, %c0_6] : memref<3x128xf32, #tpu.memory_space<vmem>>, vector<1x128xf32>
    %8 = arith.maximumf %5, %6 : vector<8x256xf32>
    %9 = vector.extract_strided_slice %8 {offsets = [0, 0], sizes = [8, 128], strides = [1, 1]} : vector<8x256xf32> to vector<8x128xf32>
    %10 = vector.extract_strided_slice %8 {offsets = [0, 128], sizes = [8, 128], strides = [1, 1]} : vector<8x256xf32> to vector<8x128xf32>
    %11 = arith.maximumf %9, %10 : vector<8x128xf32>
    %12 = vector.broadcast %7 : vector<1x128xf32> to vector<8x128xf32>
    %13 = arith.addf %11, %12 : vector<8x128xf32>
    %cst_7 = arith.constant 0.000000e+00 : f32
    %14 = vector.broadcast %cst_7 : f32 to vector<8x128xf32>
    %15 = arith.maximumf %13, %14 : vector<8x128xf32>
    %cst_8 = arith.constant 0.000000e+00 : f32
    %16 = vector.broadcast %cst_8 : f32 to vector<1x128xf32>
    %c0_9 = arith.constant 0 : index
    %c0_10 = arith.constant 0 : index
    %17 = vector.load %arg6[%c0_9, %c0_10] : memref<16x128xf32, #tpu.memory_space<vmem>>, vector<1x128xf32>
    tpu.vector_store %arg6[%c0_9, %c0_10], %16 {strides = array<i32>} : memref<16x128xf32, #tpu.memory_space<vmem>>, vector<1x128xf32>,
    %c9 = arith.constant 9 : index
    %c0_11 = arith.constant 0 : index
    %18 = vector.load %arg6[%c9, %c0_11] : memref<16x128xf32, #tpu.memory_space<vmem>>, vector<1x128xf32>
    tpu.vector_store %arg6[%c9, %c0_11], %16 {strides = array<i32>} : memref<16x128xf32, #tpu.memory_space<vmem>>, vector<1x128xf32>,
    %c1 = arith.constant 1 : index
    %c0_12 = arith.constant 0 : index
    %19 = vector.load %arg6[%c1, %c0_12] : memref<16x128xf32, #tpu.memory_space<vmem>>, vector<8x128xf32>
    tpu.vector_store %arg6[%c1, %c0_12], %15 {strides = array<i32>} : memref<16x128xf32, #tpu.memory_space<vmem>>, vector<8x128xf32>,
    %c0_13 = arith.constant 0 : index
    %c0_14 = arith.constant 0 : index
    %20 = vector.load %arg6[%c0_13, %c0_14] : memref<16x128xf32, #tpu.memory_space<vmem>>, vector<4x128xf32>
    %c1_15 = arith.constant 1 : index
    %c0_16 = arith.constant 0 : index
    %21 = vector.load %arg6[%c1_15, %c0_16] : memref<16x128xf32, #tpu.memory_space<vmem>>, vector<4x128xf32>
    %c5 = arith.constant 5 : index
    %c0_17 = arith.constant 0 : index
    %22 = vector.load %arg6[%c5, %c0_17] : memref<16x128xf32, #tpu.memory_space<vmem>>, vector<4x128xf32>
    %c6 = arith.constant 6 : index
    %c0_18 = arith.constant 0 : index
    %23 = vector.load %arg6[%c6, %c0_18] : memref<16x128xf32, #tpu.memory_space<vmem>>, vector<4x128xf32>
    %24 = tpu.concatenate %20, %22, %21 in 1 : vector<4x128xf32>, vector<4x128xf32>, vector<4x128xf32> -> vector<4x384xf32>
    %25 = arith.truncf %24 : vector<4x384xf32> to vector<4x384xbf16>
    %26 = tpu.concatenate %22, %21, %23 in 1 : vector<4x128xf32>, vector<4x128xf32>, vector<4x128xf32> -> vector<4x384xf32>
    %27 = arith.truncf %26 : vector<4x384xf32> to vector<4x384xbf16>
    %c1_19 = arith.constant 1 : index
    %c0_20 = arith.constant 0 : index
    %c0_21 = arith.constant 0 : index
    %28 = vector.load %arg2[%c1_19, %c0_20, %c0_21] : memref<2x384x256xbf16, #tpu.memory_space<vmem>>, vector<1x384x256xbf16>
    %29 = vector.shape_cast %28 : vector<1x384x256xbf16> to vector<384x256xbf16>
    %cst_22 = arith.constant dense<0.000000e+00> : vector<4x256xf32>
    %30 = tpu.matmul %25, %29, %cst_22 {dimension_numbers = #tpu.dot_dimension_numbers<[1], [0], [0], [1], [0, 0, 1, 1], [], []>} : vector<4x384xbf16>, vector<384x256xbf16>, vector<4x256xf32> -> vector<4x256xf32>
    %cst_23 = arith.constant dense<0.000000e+00> : vector<4x256xf32>
    %31 = tpu.matmul %27, %29, %cst_23 {dimension_numbers = #tpu.dot_dimension_numbers<[1], [0], [0], [1], [0, 0, 1, 1], [], []>} : vector<4x384xbf16>, vector<384x256xbf16>, vector<4x256xf32> -> vector<4x256xf32>
    %c1_24 = arith.constant 1 : index
    %c0_25 = arith.constant 0 : index
    %32 = vector.load %arg4[%c1_24, %c0_25] : memref<3x128xf32, #tpu.memory_space<vmem>>, vector<1x128xf32>
    %33 = arith.maximumf %30, %31 : vector<4x256xf32>
    %34 = vector.extract_strided_slice %33 {offsets = [0, 0], sizes = [4, 128], strides = [1, 1]} : vector<4x256xf32> to vector<4x128xf32>
    %35 = vector.extract_strided_slice %33 {offsets = [0, 128], sizes = [4, 128], strides = [1, 1]} : vector<4x256xf32> to vector<4x128xf32>
    %36 = arith.maximumf %34, %35 : vector<4x128xf32>
    %37 = vector.broadcast %32 : vector<1x128xf32> to vector<4x128xf32>
    %38 = arith.addf %36, %37 : vector<4x128xf32>
    %cst_26 = arith.constant 0.000000e+00 : f32
    %39 = vector.broadcast %cst_26 : f32 to vector<4x128xf32>
    %40 = arith.maximumf %38, %39 : vector<4x128xf32>
    %41 = arith.truncf %40 : vector<4x128xf32> to vector<4x128xbf16>
    %c0_27 = arith.constant 0 : index
    %c0_28 = arith.constant 0 : index
    %42 = vector.load %arg3[%c0_27, %c0_28] : memref<128x512xbf16, #tpu.memory_space<vmem>>, vector<128x512xbf16>
    %cst_29 = arith.constant dense<0.000000e+00> : vector<4x512xf32>
    %43 = tpu.matmul %41, %42, %cst_29 {dimension_numbers = #tpu.dot_dimension_numbers<[1], [0], [0], [1], [0, 0, 1, 1], [], []>} : vector<4x128xbf16>, vector<128x512xbf16>, vector<4x512xf32> -> vector<4x512xf32>
    %44 = vector.extract_strided_slice %43 {offsets = [0, 0], sizes = [1, 128], strides = [1, 1]} : vector<4x512xf32> to vector<1x128xf32>
    %45 = vector.extract_strided_slice %43 {offsets = [1, 128], sizes = [1, 128], strides = [1, 1]} : vector<4x512xf32> to vector<1x128xf32>
    %46 = arith.addf %44, %45 : vector<1x128xf32>
    %47 = vector.extract_strided_slice %43 {offsets = [2, 256], sizes = [1, 128], strides = [1, 1]} : vector<4x512xf32> to vector<1x128xf32>
    %48 = arith.addf %46, %47 : vector<1x128xf32>
    %49 = vector.extract_strided_slice %43 {offsets = [3, 384], sizes = [1, 128], strides = [1, 1]} : vector<4x512xf32> to vector<1x128xf32>
    %50 = arith.addf %48, %49 : vector<1x128xf32>
    %c2 = arith.constant 2 : index
    %c0_30 = arith.constant 0 : index
    %51 = vector.load %arg4[%c2, %c0_30] : memref<3x128xf32, #tpu.memory_space<vmem>>, vector<1x128xf32>
    %52 = arith.addf %50, %51 : vector<1x128xf32>
    %cst_31 = arith.constant dense<0xFF800000> : vector<1xf32>
    %53 = vector.multi_reduction <maximumf>, %52, %cst_31 [1] : vector<1x128xf32> to vector<1xf32>
    %54 = vector.shape_cast %53 : vector<1xf32> to vector<1x1xf32>
    %55 = vector.broadcast %54 : vector<1x1xf32> to vector<1x128xf32>
    %56 = arith.subf %52, %55 : vector<1x128xf32>
    %57 = math.exp %56 : vector<1x128xf32>
    %cst_32 = arith.constant dense<0.000000e+00> : vector<1xf32>
    %58 = vector.multi_reduction <add>, %57, %cst_32 [1] : vector<1x128xf32> to vector<1xf32>
    %59 = vector.shape_cast %58 : vector<1xf32> to vector<1x1xf32>
    %60 = math.log %59 : vector<1x1xf32>
    %61 = vector.broadcast %60 : vector<1x1xf32> to vector<1x128xf32>
    %62 = arith.subf %56, %61 : vector<1x128xf32>
    %63 = vector.shape_cast %62 : vector<1x128xf32> to vector<1x128xf32>
    %64 = vector.broadcast %63 : vector<1x128xf32> to vector<8x128xf32>
    %c0_33 = arith.constant 0 : index
    %c0_34 = arith.constant 0 : index
    %c0_35 = arith.constant 0 : index
    %65 = vector.load %arg5[%c0_33, %c0_34, %c0_35] : memref<1x8x128xf32, #tpu.memory_space<vmem>>, vector<1x8x128xf32>
    %66 = vector.shape_cast %65 : vector<1x8x128xf32> to vector<8x128xf32>
    %67 = vector.shape_cast %64 : vector<8x128xf32> to vector<1x8x128xf32>
    tpu.vector_store %arg5[%c0_33, %c0_34, %c0_35], %67 {strides = array<i32>} : memref<1x8x128xf32, #tpu.memory_space<vmem>>, vector<1x8x128xf32>,
    return
  }
  func.func @transform_0(%arg0: i32) -> (i32, i32, i32) {
    %c0_i32 = arith.constant 0 : i32
    %c0_i32_0 = arith.constant 0 : i32
    %c0_i32_1 = arith.constant 0 : i32
    return %arg0, %c0_i32, %c0_i32_0 : i32, i32, i32
  }
  func.func @transform_1(%arg0: i32) -> (i32, i32, i32) {
    %c0_i32 = arith.constant 0 : i32
    %c0_i32_0 = arith.constant 0 : i32
    %c0_i32_1 = arith.constant 0 : i32
    %c0_i32_2 = arith.constant 0 : i32
    return %c0_i32, %c0_i32_0, %c0_i32_1 : i32, i32, i32
  }
  func.func @transform_2(%arg0: i32) -> (i32, i32) {
    %c0_i32 = arith.constant 0 : i32
    %c0_i32_0 = arith.constant 0 : i32
    %c0_i32_1 = arith.constant 0 : i32
    return %c0_i32, %c0_i32_0 : i32, i32
  }
  func.func @transform_3(%arg0: i32) -> (i32, i32) {
    %c0_i32 = arith.constant 0 : i32
    %c0_i32_0 = arith.constant 0 : i32
    %c0_i32_1 = arith.constant 0 : i32
    return %c0_i32, %c0_i32_0 : i32, i32
  }
  func.func @transform_4(%arg0: i32) -> (i32, i32, i32) {
    %c0_i32 = arith.constant 0 : i32
    %c0_i32_0 = arith.constant 0 : i32
    %c0_i32_1 = arith.constant 0 : i32
    return %arg0, %c0_i32, %c0_i32_0 : i32, i32, i32
  }
}

</mosaic_0001>

<bundles_post_ra>
// kernel: forward.1
= control target key start
LH: loop header
LB: loop body
LE: loop exit
PB: predicated region body
PF: predicated region fallthrough
CT: control target
= control target key end

     0   :  { %9 = vsyncpa [#allocation4], 0  ;;  %s1898_s15 = smov 0   ;;  %s2248_s0 = inlined_call_operand.vmem [shape: bf16[2,16,384], index: 0, kind: input, shape index: {}]   ;;  %s2249_s1 = inlined_call_operand.hbm [shape: bf16[2,384,256], index: 1, kind: input, shape index: {}]   ;;  %s2250_s2 = inlined_call_operand.vmem [shape: bf16[128,512], index: 2, kind: input, shape index: {}]   ;;  %s2251_s3 = inlined_call_operand.vmem [shape: f32[3,128], index: 3, kind: input, shape index: {}]   ;;  %s2252_s4 = inlined_call_operand.vmem [shape: f32[2,8,128], index: 4, kind: output, shape index: {}]  }
   0x1 LB: > { %s1904_s16 = sadd.s32 4294967295, %s1866_s15   ;;  %p1464_p0 = scmp.ge.s32.totalorder %s1866_s15, 1  ;;  %s1866_s15 = sphi %s1898_s15, %s15_s15  }
   0x2   : > { %p135_p1 = scmp.lt.s32.totalorder %s1866_s15, 3  ;;  %s1868_s17 = smov [#allocation3]  }
   0x3   : > { %s147_s18 = sshll.u32 %s1868_s17, 4  ;;  %p1615_p3 = scmp.eq.s32.totalorder %s1904_s16, 0  ;;  %s148_s18 = int_to_ptr.vmem [resolvable:$true] %s147_s18 }
   0x4   : > { %p1908_p2 = pnand %p1464_p0, %p135_p1  ;;  %s1841_s20 = scalar_lea.vmem %s148_s18, 12288 }
   0x5   : > { %p1842_p7 = scmp.ne.s32.totalorder %s148_s18, %s1841_s20  ;;  %p1849_p10 = scmp.lt.s32.totalorder %s148_s18, %s148_s18 }
   0x6   : > { %p1611_p4 = pneg %p1908_p2  ;;  %p1850_p11 = scmp.lt.s32.totalorder %s1841_s20, %s1841_s20 }
   0x8   : > { %p1612_p5 = pnand %p1615_p3, %p1611_p4  ;;  %p1851_p12 = por %p1850_p11, %p1849_p10 }
   0xa   : > { %p1832_p6 = pneg %p1612_p5 }
   0xc   : > { %p1844_p8 = pnand %p1842_p7, %p1832_p6 }
   0xe   : > { %p1845_p9 = pneg %p1844_p8 }
  0x10   : > { %p1852_p13 = pnand %p1851_p12, %p1845_p9 }
  0x12   : > { %1855 = shalt.err (!%p1852_p13)
}
  0x13   : > { %s1869_s21 = smov 128   ;;  %s1870_s22 = smov 8  }
  0x14   : > { %1614 = dma.hbm_to_vmem [thread:$0]  (!%p1612_p5), %s2249_s1, 12288, %s148_s18, [#allocation4], %s1869_s21, %s1869_s21, %s1870_s22  }
  0x15   : > { %177 = sbr.rel (%p1908_p2) target bundleno = 1104 (0x450), region = 36 }
  0x1a   : > { %1861 = dma.done.wait (%p1615_p3), [#allocation4], 12288  }
  0x1b   : > { %1863 = vsyncadd (%p1615_p3), [#allocation4], 4294955008  ;;  %v2253_v0 = vmov 0   ;;  %v1630_v1 = vld [vmem:[#allocation3 + $0x74] ss:$8 sps:$4 sm:$0xff]   ;;  %p202_p0 = scmp.lt.s32.totalorder %s1904_s16, 1 }
  0x1c   : > { %595 = vmatprep.mubr.bf16.mxu1 %v2253_v0  ;;  %v1632_v2 = vld [vmem:[#allocation3 + $0x70] ss:$8 sps:$4 sm:$0xff]   ;;  %520 = vmatprep.subr.bf16.mxu0 %v1630_v1  ;;  %v1633_v3 = vld [vmem:[#allocation3 + $0x64] ss:$8 sps:$4 sm:$0xff]   ;;  %v1635_v4 = vld [vmem:[#allocation3 + $0x60] ss:$8 sps:$4 sm:$0xff]  }
  0x1d   : > { %521 = vmatpush1.bf16.msra.mxu0 %v1632_v2  ;;  %v1636_v5 = vld [vmem:[#allocation3 + $0x54] ss:$8 sps:$4 sm:$0xff]   ;;  %v1638_v6 = vld [vmem:[#allocation3 + $0x50] ss:$8 sps:$4 sm:$0xff]   ;;  %v1639_v7 = vld [vmem:[#allocation3 + $0x44] ss:$8 sps:$4 sm:$0xff]  }
  0x1e   : > { %522 = vmatprep.subr.bf16.mxu0 %v1633_v3  ;;  %v1651_v8 = vld [vmem:[#allocation3 + $0x174] ss:$8 sps:$4 sm:$0xff]   ;;  %v1653_v9 = vld [vmem:[#allocation3 + $0x170] ss:$8 sps:$4 sm:$0xff]   ;;  %v1641_v10 = vld [vmem:[#allocation3 + $0x40] ss:$8 sps:$4 sm:$0xff]  }
  0x1f   : > { %v1642_v11 = vld [vmem:[#allocation3 + $0x34] ss:$8 sps:$4 sm:$0xff]   ;;  %563 = vmatprep.subr.bf16.mxu1 %v1651_v8  ;;  %v1657_v12 = vld [vmem:[#allocation3 + $0x164] ss:$8 sps:$4 sm:$0xff]   ;;  %v1659_v13 = vld [vmem:[#allocation3 + $0x160] ss:$8 sps:$4 sm:$0xff]  }
  0x20   : > { %564 = vmatpush1.bf16.msra.mxu1 %v1653_v9  ;;  %v1644_v14 = vld [vmem:[#allocation3 + $0x30] ss:$8 sps:$4 sm:$0xff]   ;;  %v1663_v15 = vld [vmem:[#allocation3 + $0x154] ss:$8 sps:$4 sm:$0xff]   ;;  %v1645_v16 = vld [vmem:[#allocation3 + $0x24] ss:$8 sps:$4 sm:$0xff]  }
  0x21   : > { %523 = vmatpush1.bf16.msra.mxu0 %v1635_v4  ;;  %565 = vmatprep.subr.bf16.mxu1 %v1657_v12  ;;  %v1665_v17 = vld [vmem:[#allocation3 + $0x150] ss:$8 sps:$4 sm:$0xff]   ;;  %v1669_v18 = vld [vmem:[#allocation3 + $0x144] ss:$8 sps:$4 sm:$0xff]   ;;  %v1647_v19 = vld [vmem:[#allocation3 + $0x20] ss:$8 sps:$4 sm:$0xff]  }
  0x22   : > { %524 = vmatprep.subr.bf16.mxu0 %v1636_v5  ;;  %v1648_v20 = vld [vmem:[#allocation3 + $0x14] ss:$8 sps:$4 sm:$0xff]   ;;  %v1671_v21 = vld [vmem:[#allocation3 + $0x140] ss:$8 sps:$4 sm:$0xff]   ;;  %s2270_s16 = smov (!%p202_p0, %s1904_s16), 1  ;;  %vm1379_vm0 = vcmask 1040384  }
  0x23   : > { %v1675_v22 = vld [vmem:[#allocation3 + $0x134] ss:$8 sps:$4 sm:$0xff]   ;;  %v1650_v23 = vld [vmem:[#allocation3 + $0x10] ss:$8 sps:$4 sm:$0xff]   ;;  %v1654_v24 = vld [vmem:[#allocation3 + $0x4] ss:$8 sps:$4 sm:$0xff]  }
  0x24   : > { %566 = vmatpush1.bf16.msra.mxu1 %v1659_v13  ;;  %v1677_v25 = vld [vmem:[#allocation3 + $0x130] ss:$8 sps:$4 sm:$0xff]   ;;  %s1606_s25 = smul.u32 24, %s2270_s16  ;;  %v1681_v26 = vld [vmem:[#allocation3 + $0x124] ss:$8 sps:$4 sm:$0xff]   ;;  %s1470_s27 = sshll.u32 %s2270_s16, 3 }
  0x25   : > { %525 = vmatpush1.bf16.msra.mxu0 %v1638_v6  ;;  %567 = vmatprep.subr.bf16.mxu1 %v1663_v15  ;;  %v1656_v27 = vld [vmem:[#allocation3] ss:$8 sps:$4 sm:$0xff]   ;;  %v1660_v28 = vld [vmem:[#allocation3 + $0xf4] ss:$8 sps:$4 sm:$0xff]   ;;  %v1662_v31 = vld [vmem:[#allocation3 + $0xf0] ss:$8 sps:$4 sm:$0xff]   ;;  %s210_s30 = scalar_lea.vmem %s2252_s4, %s1470_s27 }
  0x26   : > { %526 = vmatprep.subr.bf16.mxu0 %v1639_v7  ;;  %v1683_v29 = vld [vmem:[#allocation3 + $0x120] ss:$8 sps:$4 sm:$0xff]   ;;  %s1935_s28 = scalar_lea.vmem %s2248_s0, %s1606_s25  ;;  %v1687_v30 = vld [vmem:[#allocation3 + $0x114] ss:$8 sps:$4 sm:$0xff]   ;;  %v1666_v32 = vld [vmem:[#allocation3 + $0xe4] ss:$8 sps:$4 sm:$0xff]  }
  0x27   : > { %v1689_v33 = vld [vmem:[#allocation3 + $0x110] ss:$8 sps:$4 sm:$0xff]   ;;  %v1693_v34 = vld [vmem:[#allocation3 + $0x104] ss:$8 sps:$4 sm:$0xff]   ;;  %v1705_v35 = vld [vmem:[%s1935_s28 + $0x4] ss:$12 sps:$4 sm:$0xff]  }
  0x28   : > { %568 = vmatpush1.bf16.msra.mxu1 %v1665_v17  ;;  %v1668_v36 = vld [vmem:[#allocation3 + $0xe0] ss:$8 sps:$4 sm:$0xff]   ;;  %v1672_v37 = vld [vmem:[#allocation3 + $0xd4] ss:$8 sps:$4 sm:$0xff]   ;;  %552 = vmatprep.mubr.bf16.mxu0 %v1705_v35  ;;  %v1674_v40 = vld [vmem:[#allocation3 + $0xd0] ss:$8 sps:$4 sm:$0xff]  }
  0x29   : > { %527 = vmatpush1.bf16.msra.mxu0 %v1641_v10  ;;  %569 = vmatprep.subr.bf16.mxu1 %v1669_v18  ;;  %v1695_v38 = vld [vmem:[#allocation3 + $0x100] ss:$8 sps:$4 sm:$0xff]   ;;  %v1938_v39 = vld [vmem:[#allocation3 + $0x1f4] ss:$8 sps:$4 sm:$0xff]   ;;  %v1678_v41 = vld [vmem:[#allocation3 + $0xc4] ss:$8 sps:$4 sm:$0xff]  }
  0x2a   : > { %528 = vmatprep.subr.bf16.mxu0 %v1642_v11  ;;  %v1699_v42 = vld [vmem:[%s1935_s28 + $0x8] ss:$12 sps:$4 sm:$0xff]   ;;  %v1680_v45 = vld [vmem:[#allocation3 + $0xc0] ss:$8 sps:$4 sm:$0xff]   ;;  %v1684_v46 = vld [vmem:[#allocation3 + $0xb4] ss:$8 sps:$4 sm:$0xff]  }
  0x2b   : > { %v1941_v43 = vld [vmem:[#allocation3 + $0x1f0] ss:$8 sps:$4 sm:$0xff]   ;;  %v1944_v44 = vld [vmem:[#allocation3 + $0x1e4] ss:$8 sps:$4 sm:$0xff]   ;;  %v1946_v47 = vld [vmem:[#allocation3 + $0x1e0] ss:$8 sps:$4 sm:$0xff]  }
  0x2c   : > { %570 = vmatpush1.bf16.msra.mxu1 %v1671_v21  ;;  %v1948_v48 = vld [vmem:[#allocation3 + $0x1d4] ss:$8 sps:$4 sm:$0xff]   ;;  %v1686_v49 = vld [vmem:[#allocation3 + $0xb0] ss:$8 sps:$4 sm:$0xff]   ;;  %v1690_v50 = vld [vmem:[#allocation3 + $0xa4] ss:$8 sps:$4 sm:$0xff]  }
  0x2d   : > { %529 = vmatpush1.bf16.msra.mxu0 %v1644_v14  ;;  %571 = vmatprep.subr.bf16.mxu1 %v1675_v22  ;;  %v1952_v51 = vld [vmem:[#allocation3 + $0x1d0] ss:$8 sps:$4 sm:$0xff]   ;;  %v1954_v52 = vld [vmem:[#allocation3 + $0x1c4] ss:$8 sps:$4 sm:$0xff]   ;;  %v1692_v53 = vld [vmem:[#allocation3 + $0xa0] ss:$8 sps:$4 sm:$0xff]  }
  0x2e   : > { %530 = vmatprep.subr.bf16.mxu0 %v1645_v16  ;;  %v1696_v54 = vld [vmem:[#allocation3 + $0x94] ss:$8 sps:$4 sm:$0xff]   ;;  %v1958_v55 = vld [vmem:[#allocation3 + $0x1c0] ss:$8 sps:$4 sm:$0xff]   ;;  %v1698_v57 = vld [vmem:[#allocation3 + $0x90] ss:$8 sps:$4 sm:$0xff]  }
  0x2f   : > { %v1960_v56 = vld [vmem:[#allocation3 + $0x1b4] ss:$8 sps:$4 sm:$0xff]   ;;  %v1700_v58 = vld [vmem:[#allocation3 + $0x84] ss:$8 sps:$4 sm:$0xff]   ;;  %v1964_v59 = vld [vmem:[#allocation3 + $0x1b0] ss:$8 sps:$4 sm:$0xff]  }
  0x30   : > { %572 = vmatpush1.bf16.msra.mxu1 %v1677_v25  ;;  %v1966_v60 = vld [vmem:[#allocation3 + $0x1a4] ss:$8 sps:$4 sm:$0xff]   ;;  %v1702_v61 = vld [vmem:[#allocation3 + $0x80] ss:$8 sps:$4 sm:$0xff]   ;;  %v1703_v63 = vld [vmem:[%s1935_s28] ss:$12 sps:$4 sm:$0xff]  }
  0x31   : > { %531 = vmatpush1.bf16.msra.mxu0 %v1647_v19  ;;  %573 = vmatprep.subr.bf16.mxu1 %v1681_v26  ;;  %v1970_v62 = vld [vmem:[#allocation3 + $0x1a0] ss:$8 sps:$4 sm:$0xff]   ;;  %v1973_v1 = vld [vmem:[#allocation3 + $0x194] ss:$8 sps:$4 sm:$0xff]   ;;  %v1977_v2 = vld [vmem:[#allocation3 + $0x190] ss:$8 sps:$4 sm:$0xff]  }
  0x32   : > { %532 = vmatprep.subr.bf16.mxu0 %v1648_v20  ;;  %v1981_v3 = vld [vmem:[#allocation3 + $0x184] ss:$8 sps:$4 sm:$0xff]   ;;  %v1985_v4 = vld [vmem:[#allocation3 + $0x180] ss:$8 sps:$4 sm:$0xff]   ;;  %v1989_v5 = vld [vmem:[#allocation3 + $0x2f0] ss:$8 sps:$4 sm:$0xff]  }
  0x33   : > { %v1991_v6 = vld [vmem:[#allocation3 + $0x2f4] ss:$8 sps:$4 sm:$0xff]   ;;  %v1993_v7 = vld [vmem:[#allocation3 + $0x270] ss:$8 sps:$4 sm:$0xff]   ;;  %v2001_v9 = vld [vmem:[#allocation3 + $0x2e0] ss:$8 sps:$4 sm:$0xff]  }
  0x34   : > { %574 = vmatpush1.bf16.msra.mxu1 %v1683_v29  ;;  %v1995_v8 = vld [vmem:[#allocation3 + $0x274] ss:$8 sps:$4 sm:$0xff]   ;;  %v2003_v10 = vld [vmem:[#allocation3 + $0x2e4] ss:$8 sps:$4 sm:$0xff]   ;;  %v2005_v11 = vld [vmem:[#allocation3 + $0x260] ss:$8 sps:$4 sm:$0xff]  }
  0x35   : > { %533 = vmatpush1.bf16.msra.mxu0 %v1650_v23  ;;  %575 = vmatprep.subr.bf16.mxu1 %v1687_v30  ;;  %v2007_v12 = vld [vmem:[#allocation3 + $0x264] ss:$8 sps:$4 sm:$0xff]   ;;  %v2013_v13 = vld [vmem:[#allocation3 + $0x2d4] ss:$8 sps:$4 sm:$0xff]   ;;  %v2015_v14 = vld [vmem:[#allocation3 + $0x2d0] ss:$8 sps:$4 sm:$0xff]  }
  0x36   : > { %534 = vmatprep.subr.bf16.mxu0 %v1654_v24  ;;  %v2017_v15 = vld [vmem:[#allocation3 + $0x254] ss:$8 sps:$4 sm:$0xff]   ;;  %v2020_v16 = vld [vmem:[#allocation3 + $0x250] ss:$8 sps:$4 sm:$0xff]   ;;  %v2025_v17 = vld [vmem:[#allocation3 + $0x2c4] ss:$8 sps:$4 sm:$0xff]  }
  0x37   : > { %v2027_v18 = vld [vmem:[#allocation3 + $0x2c0] ss:$8 sps:$4 sm:$0xff]   ;;  %v2029_v19 = vld [vmem:[#allocation3 + $0x244] ss:$8 sps:$4 sm:$0xff]   ;;  %v2037_v21 = vld [vmem:[#allocation3 + $0x2b4] ss:$8 sps:$4 sm:$0xff]  }
  0x38   : > { %576 = vmatpush1.bf16.msra.mxu1 %v1689_v33  ;;  %v2032_v20 = vld [vmem:[#allocation3 + $0x240] ss:$8 sps:$4 sm:$0xff]   ;;  %v2039_v22 = vld [vmem:[#allocation3 + $0x2b0] ss:$8 sps:$4 sm:$0xff]   ;;  %v2041_v23 = vld [vmem:[#allocation3 + $0x234] ss:$8 sps:$4 sm:$0xff]  }
  0x39   : > { %535 = vmatpush1.bf16.msra.mxu0 %v1656_v27  ;;  %577 = vmatprep.subr.bf16.mxu1 %v1693_v34  ;;  %v2044_v24 = vld [vmem:[#allocation3 + $0x230] ss:$8 sps:$4 sm:$0xff]   ;;  %v2049_v25 = vld [vmem:[#allocation3 + $0x2a4] ss:$8 sps:$4 sm:$0xff]   ;;  %v2051_v26 = vld [vmem:[#allocation3 + $0x2a0] ss:$8 sps:$4 sm:$0xff]  }
  0x3a   : > { %536 = vmatprep.subr.bf16.mxu0 %v1660_v28  ;;  %v2053_v27 = vld [vmem:[#allocation3 + $0x224] ss:$8 sps:$4 sm:$0xff]   ;;  %v2056_v28 = vld [vmem:[#allocation3 + $0x220] ss:$8 sps:$4 sm:$0xff]   ;;  %v2061_v29 = vld [vmem:[#allocation3 + $0x294] ss:$8 sps:$4 sm:$0xff]  }
  0x3b   : > { %v2063_v30 = vld [vmem:[#allocation3 + $0x290] ss:$8 sps:$4 sm:$0xff]   ;;  %v2070_v33 = vld [vmem:[#allocation3 + $0x284] ss:$8 sps:$4 sm:$0xff]   ;;  %v2074_v34 = vld [vmem:[#allocation3 + $0x280] ss:$8 sps:$4 sm:$0xff]  }
  0x3c   : > { %578 = vmatpush1.bf16.msra.mxu1 %v1695_v38  ;;  %v2076_v35 = vld [vmem:[#allocation3 + $0x204] ss:$8 sps:$4 sm:$0xff]  }
  0x3d   : > { %537 = vmatpush2.bf16.msra.mxu0 %v1662_v31  ;;  %916 = vmatprep.subr.bf16.mxu1 %v1938_v39  ;;  %v2065_v31 = vld [vmem:[#allocation3 + $0x210] ss:$8 sps:$4 sm:$0xff]   ;;  %2262 = vst [vmem:[#allocation8_spill] sm:$0xff] %v2076_v35 }
  0x3e   : > { %538 = vmatprep.subr.bf16.mxu0 %v1666_v32  ;;  %2260 = vst [vmem:[#allocation6_spill] sm:$0xff] %v2065_v31  ;;  %v2067_v32 = vld [vmem:[#allocation3 + $0x214] ss:$8 sps:$4 sm:$0xff]  }
  0x3f   : > { %596 = vmatmul.mubr.bf16.vlgmr.msra.gmra.mxu1 %v1699_v42  ;;  %2261 = vst [vmem:[#allocation7_spill] sm:$0xff] %v2067_v32 }
  0x40   : > { %917 = vmatpush1.bf16.msra.mxu1 %v1941_v43 }
  0x41   : > { %539 = vmatpush2.bf16.msra.mxu0 %v1668_v36  ;;  %918 = vmatprep.subr.bf16.mxu1 %v1944_v44  ;;  %v2080_v36 = vld [vmem:[#allocation3 + $0x200] ss:$8 sps:$4 sm:$0xff]  }
  0x42   : > { %540 = vmatprep.subr.bf16.mxu0 %v1672_v37  ;;  %2263 = vst [vmem:[#allocation9_spill] sm:$0xff] %v2080_v36  ;;  %v1872_v37 = vmov 0.0  }
  0x43   : > { %616 = vst [vmem:[#allocation2] sm:$0x1] %v1872_v37  ;;  %617 = vst [vmem:[#allocation2 + $0x9] sm:$0x1] %v1872_v37 }
  0x44   : > { %919 = vmatpush1.bf16.msra.mxu1 %v1946_v47 }
  0x45   : > { %541 = vmatpush2.bf16.msra.mxu0 %v1674_v40  ;;  %920 = vmatprep.subr.bf16.mxu1 %v1948_v48 }
  0x46   : > { %542 = vmatprep.subr.bf16.mxu0 %v1678_v41 }
  0x48   : > { %921 = vmatpush1.bf16.msra.mxu1 %v1952_v51 }
  0x49   : > { %543 = vmatpush2.bf16.msra.mxu0 %v1680_v45  ;;  %922 = vmatprep.subr.bf16.mxu1 %v1954_v52 }
  0x4a   : > { %544 = vmatprep.subr.bf16.mxu0 %v1684_v46 }
  0x4c   : > { %923 = vmatpush1.bf16.msra.mxu1 %v1958_v55 }
  0x4d   : > { %545 = vmatpush2.bf16.msra.mxu0 %v1686_v49  ;;  %924 = vmatprep.subr.bf16.mxu1 %v1960_v56 }
  0x4e   : > { %546 = vmatprep.subr.bf16.mxu0 %v1690_v50 }
  0x50   : > { %925 = vmatpush1.bf16.msra.mxu1 %v1964_v59 }
  0x51   : > { %547 = vmatpush2.bf16.msra.mxu0 %v1692_v53  ;;  %926 = vmatprep.subr.bf16.mxu1 %v1966_v60 }
  0x52   : > { %548 = vmatprep.subr.bf16.mxu0 %v1696_v54 }
  0x54   : > { %927 = vmatpush1.bf16.msra.mxu1 %v1970_v62 }
  0x55   : > { %549 = vmatpush2.bf16.msra.mxu0 %v1698_v57  ;;  %928 = vmatprep.subr.bf16.mxu1 %v1973_v1 }
  0x56   : > { %550 = vmatprep.subr.bf16.mxu0 %v1700_v58 }
  0x58   : > { %929 = vmatpush1.bf16.msra.mxu1 %v1977_v2 }
  0x59   : > { %551 = vmatpush2.bf16.msra.mxu0 %v1702_v61  ;;  %930 = vmatprep.subr.bf16.mxu1 %v1981_v3 }
  0x5a   : > { %957 = vmatprep.subr.bf16.mxu0 %v1991_v6 }
  0x5c   : > { %553 = vmatmul.mubr.bf16.vlgmr.msra.gmra.mxu0 %v1703_v63  ;;  %931 = vmatpush1.bf16.msra.mxu1 %v1985_v4 }
  0x5d   : > { %989 = vmatprep.mubr.bf16.mxu0 %v2253_v0  ;;  %932 = vmatprep.subr.bf16.mxu1 %v1995_v8 }
  0x5e   : > { %958 = vmatpush1.bf16.msra.mxu0 %v1989_v5 }
  0x5f   : > { %959 = vmatprep.subr.bf16.mxu0 %v2003_v10 }
  0x60   : > { %933 = vmatpush2.bf16.msra.mxu1 %v1993_v7 }
  0x61   : > { %934 = vmatprep.subr.bf16.mxu1 %v2007_v12 }
  0x62   : > { %960 = vmatpush1.bf16.msra.mxu0 %v2001_v9 }
  0x63   : > { %961 = vmatprep.subr.bf16.mxu0 %v2013_v13 }
  0x64   : > { %935 = vmatpush2.bf16.msra.mxu1 %v2005_v11 }
  0x65   : > { %936 = vmatprep.subr.bf16.mxu1 %v2017_v15 }
  0x66   : > { %962 = vmatpush1.bf16.msra.mxu0 %v2015_v14 }
  0x67   : > { %963 = vmatprep.subr.bf16.mxu0 %v2025_v17 }
  0x68   : > { %937 = vmatpush2.bf16.msra.mxu1 %v2020_v16 }
  0x69   : > { %938 = vmatprep.subr.bf16.mxu1 %v2029_v19 }
  0x6a   : > { %964 = vmatpush1.bf16.msra.mxu0 %v2027_v18 }
  0x6b   : > { %965 = vmatprep.subr.bf16.mxu0 %v2037_v21 }
  0x6c   : > { %939 = vmatpush2.bf16.msra.mxu1 %v2032_v20 }
  0x6d   : > { %940 = vmatprep.subr.bf16.mxu1 %v2041_v23 }
  0x6e   : > { %966 = vmatpush1.bf16.msra.mxu0 %v2039_v22 }
  0x6f   : > { %967 = vmatprep.subr.bf16.mxu0 %v2049_v25 }
  0x70   : > { %941 = vmatpush2.bf16.msra.mxu1 %v2044_v24 }
  0x71   : > { %942 = vmatprep.subr.bf16.mxu1 %v2053_v27 }
  0x72   : > { %968 = vmatpush1.bf16.msra.mxu0 %v2051_v26 }
  0x73   : > { %969 = vmatprep.subr.bf16.mxu0 %v2061_v29 }
  0x74   : > { %943 = vmatpush2.bf16.msra.mxu1 %v2056_v28 }
  0x75   : > { %944 = vmatprep.subr.bf16.mxu1 %v2067_v32 }
  0x76   : > { %970 = vmatpush1.bf16.msra.mxu0 %v2063_v30 }
  0x77   : > { %971 = vmatprep.subr.bf16.mxu0 %v2070_v33 }
  0x78   : > { %945 = vmatpush2.bf16.msra.mxu1 %v2065_v31 }
  0x79   : > { %946 = vmatprep.subr.bf16.mxu1 %v2076_v35 }
  0x7a   : > { %972 = vmatpush1.bf16.msra.mxu0 %v2074_v34 }
  0x7b   : > { %998 = vmatprep.subr.bf16.mxu0 %v1938_v39  ;;  %v1522_v39 = vld [vmem:[%s2251_s3] ss:$0 sm:$0xff] }
  0x7c   : > { %947 = vmatpush2.bf16.msra.mxu1 %v2080_v36 }
  0x7d   : > { %1039 = vmatprep.subr.bf16.mxu1 %v1991_v6 }
  0xff   : > { %v597_v38 = vpop.f32.mrf.mxu1 }
 0x101   : > { %v599_v40 = vpop.f32.mrf.mxu1 }
 0x103   : > { %v601_v42 = vpop.f32.mrf.mxu1 }
 0x105   : > { %v603_v50 = vpop.f32.mrf.mxu1 }
 0x11c   : > { %v554_v41 = vpop.f32.mrf.mxu0 }
 0x11d   : > { %v598_v54 = vadd.f32 %v597_v38, %v554_v41  ;;  %v2264_v38 = vmov 0  }
 0x11e   : > { %v556_v45 = vpop.f32.mrf.mxu0 }
 0x11f   : > { %v600_v57 = vadd.f32 %v599_v40, %v556_v45 }
 0x120   : > { %v558_v46 = vpop.f32.mrf.mxu0 }
 0x121   : > { %v602_v49 = vadd.f32 %v601_v42, %v558_v46 }
 0x122   : > { %v560_v53 = vpop.f32.mrf.mxu0 }
 0x123   : > { %v604_v58 = vadd.f32 %v603_v50, %v560_v53  ;;  %v607_v61 = vmax.f32 %v598_v54, %v602_v49 }
 0x125   : > { %v608_v63 = vmax.f32 %v600_v57, %v604_v58 }
 0x127   : > { %v609_v37 = vmax.f32 %v607_v61, %v608_v63 }
 0x129   : > { %v614_v6 = vadd.f32 %v1522_v39, %v609_v37  ;;  %v1571_v37 = vld [vmem:[%s2251_s3 + $0x1] ss:$0 sm:$0xff] }
 0x12b   : > { %v615_v0 = vmax.f32 %v614_v6, 0.0 }
 0x12d   : > { %618 = vst [vmem:[#allocation2 + $0x1] sm:$0xff] %v615_v0 }
 0x134   : > { %v621_v36 = vld [vmem:[#allocation2 + $0x5] sm:$0xf]  ;;  %v620_v35 = vld [vmem:[#allocation2 + $0x1] sm:$0xf] }
 0x135   : > { %v619_v31 = vld [vmem:[#allocation2] sm:$0xf]  ;;  %v624_v32 = vpack.c.bf16 %v621_v36, %v621_v36  ;;  %v625_v42 = vpack.c.bf16 %v620_v35, %v620_v35  ;;  %v622_v0 = vld [vmem:[#allocation2 + $0x6] sm:$0xf] }
 0x136   : > { %v623_v46 = vpack.c.bf16 %v619_v31, %v619_v31 }
 0x137   : > { %948 = vmatprep.mubr.bf16.mxu1 %v624_v32  ;;  %990 = vmatmul.mubr.bf16.vlgmr.msra.gmra.mxu0 %v625_v42 }
 0x138   : > { %999 = vmatpush1.bf16.msra.mxu0 %v1941_v43  ;;  %949 = vmatmul.mubr.bf16.vlgmr.msra.gmra.mxu1 %v623_v46  ;;  %v626_v43 = vpack.c.bf16 %v622_v0, %v622_v0 }
 0x139   : > { %1030 = vmatprep.mubr.bf16.mxu0 %v625_v42  ;;  %1040 = vmatpush1.bf16.msra.mxu1 %v1989_v5  ;;  %v1790_v5 = vld [vmem:[%s2250_s2 + $0xa0] ss:$16 sps:$4 sm:$0xff]  }
 0x13a   : > { %1000 = vmatprep.subr.bf16.mxu0 %v1944_v44  ;;  %1041 = vmatprep.subr.bf16.mxu1 %v2003_v10  ;;  %v2265_v44 = vld [vmem:[#allocation7_spill] sm:$0xff]  ;;  %v1796_v10 = vld [vmem:[%s2250_s2 + $0x80] ss:$16 sps:$4 sm:$0xff]  }
 0x13b   : > { %1071 = vmatprep.mubr.bf16.mxu1 %v2264_v38 }
 0x13c   : > { %1001 = vmatpush1.bf16.msra.mxu0 %v1946_v47  ;;  %v2266_v47 = vld [vmem:[#allocation6_spill] sm:$0xff] }
 0x13d   : > { %1042 = vmatpush1.bf16.msra.mxu1 %v2001_v9  ;;  %1002 = vmatprep.subr.bf16.mxu0 %v1948_v48  ;;  %v2267_v48 = vld [vmem:[#allocation8_spill] sm:$0xff]  ;;  %v1801_v9 = vld [vmem:[%s2250_s2 + $0x8c] ss:$16 sps:$4 sm:$0xff]  }
 0x13e   : > { %1043 = vmatprep.subr.bf16.mxu1 %v2013_v13  ;;  %v1807_v13 = vld [vmem:[%s2250_s2 + $0x6c] ss:$16 sps:$4 sm:$0xff]  }
 0x140   : > { %1003 = vmatpush1.bf16.msra.mxu0 %v1952_v51  ;;  %v2268_v51 = vld [vmem:[#allocation9_spill] sm:$0xff] }
 0x141   : > { %1044 = vmatpush1.bf16.msra.mxu1 %v2015_v14  ;;  %1004 = vmatprep.subr.bf16.mxu0 %v1954_v52  ;;  %v1778_v52 = vld [vmem:[%s2250_s2 + $0xe0] ss:$16 sps:$4 sm:$0xff]  }
 0x142   : > { %1045 = vmatprep.subr.bf16.mxu1 %v2025_v17  ;;  %v1802_v14 = vld [vmem:[%s2250_s2 + $0x60] ss:$16 sps:$4 sm:$0xff]   ;;  %v1813_v17 = vld [vmem:[%s2250_s2 + $0x4c] ss:$16 sps:$4 sm:$0xff]  }
 0x144   : > { %1005 = vmatpush1.bf16.msra.mxu0 %v1958_v55  ;;  %v1780_v55 = vld [vmem:[%s2250_s2 + $0xe4] ss:$16 sps:$4 sm:$0xff]  }
 0x145   : > { %1046 = vmatpush1.bf16.msra.mxu1 %v2027_v18  ;;  %1006 = vmatprep.subr.bf16.mxu0 %v1960_v56  ;;  %v1781_v56 = vld [vmem:[%s2250_s2 + $0xe8] ss:$16 sps:$4 sm:$0xff]   ;;  %v1808_v18 = vld [vmem:[%s2250_s2 + $0x40] ss:$16 sps:$4 sm:$0xff]  }
 0x146   : > { %1047 = vmatprep.subr.bf16.mxu1 %v2037_v21  ;;  %v1819_v21 = vld [vmem:[%s2250_s2 + $0x2c] ss:$16 sps:$4 sm:$0xff]  }
 0x148   : > { %1007 = vmatpush1.bf16.msra.mxu0 %v1964_v59  ;;  %v1783_v59 = vld [vmem:[%s2250_s2 + $0xec] ss:$16 sps:$4 sm:$0xff]  }
 0x149   : > { %1048 = vmatpush1.bf16.msra.mxu1 %v2039_v22  ;;  %1008 = vmatprep.subr.bf16.mxu0 %v1966_v60  ;;  %v1786_v60 = vld [vmem:[%s2250_s2 + $0xc4] ss:$16 sps:$4 sm:$0xff]   ;;  %v1814_v22 = vld [vmem:[%s2250_s2 + $0x20] ss:$16 sps:$4 sm:$0xff]  }
 0x14a   : > { %1049 = vmatprep.subr.bf16.mxu1 %v2049_v25  ;;  %v1825_v25 = vld [vmem:[%s2250_s2 + $0xc] ss:$16 sps:$4 sm:$0xff]  }
 0x14c   : > { %1009 = vmatpush1.bf16.msra.mxu0 %v1970_v62  ;;  %v1789_v62 = vld [vmem:[%s2250_s2 + $0xcc] ss:$16 sps:$4 sm:$0xff]  }
 0x14d   : > { %1050 = vmatpush1.bf16.msra.mxu1 %v2051_v26  ;;  %1010 = vmatprep.subr.bf16.mxu0 %v1973_v1  ;;  %v1784_v1 = vld [vmem:[%s2250_s2 + $0xc0] ss:$16 sps:$4 sm:$0xff]  }
 0x14e   : > { %1051 = vmatprep.subr.bf16.mxu1 %v2061_v29  ;;  %v1820_v26 = vld [vmem:[%s2250_s2] ss:$16 sps:$4 sm:$0xff]  }
 0x150   : > { %1011 = vmatpush1.bf16.msra.mxu0 %v1977_v2  ;;  %v1787_v2 = vld [vmem:[%s2250_s2 + $0xc8] ss:$16 sps:$4 sm:$0xff]  }
 0x151   : > { %1052 = vmatpush1.bf16.msra.mxu1 %v2063_v30  ;;  %1012 = vmatprep.subr.bf16.mxu0 %v1981_v3  ;;  %v1792_v3 = vld [vmem:[%s2250_s2 + $0xa4] ss:$16 sps:$4 sm:$0xff]  }
 0x152   : > { %1053 = vmatprep.subr.bf16.mxu1 %v2070_v33 }
 0x154   : > { %1013 = vmatpush1.bf16.msra.mxu0 %v1985_v4  ;;  %v1795_v4 = vld [vmem:[%s2250_s2 + $0xac] ss:$16 sps:$4 sm:$0xff]  }
 0x155   : > { %1054 = vmatpush1.bf16.msra.mxu1 %v2074_v34  ;;  %1014 = vmatprep.subr.bf16.mxu0 %v1995_v8  ;;  %v1798_v8 = vld [vmem:[%s2250_s2 + $0x84] ss:$16 sps:$4 sm:$0xff]  }
 0x156   : > { %1283 = vmatprep.subr.bf16.mxu1 %v1780_v55 }
 0x158   : > { %1015 = vmatpush2.bf16.msra.mxu0 %v1993_v7  ;;  %1072 = vmatmul.mubr.bf16.vlgmr.msra.gmra.mxu1 %v626_v43  ;;  %v1793_v7 = vld [vmem:[%s2250_s2 + $0xa8] ss:$16 sps:$4 sm:$0xff]  }
 0x159   : > { %1016 = vmatprep.subr.bf16.mxu0 %v2007_v12  ;;  %1315 = vmatprep.mubr.bf16.mxu1 %v2264_v38  ;;  %v1804_v12 = vld [vmem:[%s2250_s2 + $0x64] ss:$16 sps:$4 sm:$0xff]  }
 0x15a   : > { %1284 = vmatpush1.bf16.msra.mxu1 %v1778_v52 }
 0x15b   : > { %1285 = vmatprep.subr.bf16.mxu1 %v1786_v60 }
 0x15c   : > { %1017 = vmatpush2.bf16.msra.mxu0 %v2005_v11  ;;  %v1799_v11 = vld [vmem:[%s2250_s2 + $0x88] ss:$16 sps:$4 sm:$0xff]  }
 0x15d   : > { %1018 = vmatprep.subr.bf16.mxu0 %v2017_v15  ;;  %v1805_v15 = vld [vmem:[%s2250_s2 + $0x68] ss:$16 sps:$4 sm:$0xff]  }
 0x15e   : > { %1286 = vmatpush1.bf16.msra.mxu1 %v1784_v1 }
 0x15f   : > { %1287 = vmatprep.subr.bf16.mxu1 %v1792_v3  ;;  %v1377_v3 = vld [vmem:[%s2251_s3 + $0x2] sm:$0x1] }
 0x160   : > { %1019 = vmatpush2.bf16.msra.mxu0 %v2020_v16  ;;  %v1810_v16 = vld [vmem:[%s2250_s2 + $0x44] ss:$16 sps:$4 sm:$0xff]  }
 0x161   : > { %1020 = vmatprep.subr.bf16.mxu0 %v2029_v19  ;;  %v1811_v19 = vld [vmem:[%s2250_s2 + $0x48] ss:$16 sps:$4 sm:$0xff]  }
 0x162   : > { %1288 = vmatpush1.bf16.msra.mxu1 %v1790_v5 }
 0x163   : > { %1289 = vmatprep.subr.bf16.mxu1 %v1798_v8 }
 0x164   : > { %1021 = vmatpush2.bf16.msra.mxu0 %v2032_v20  ;;  %v1816_v20 = vld [vmem:[%s2250_s2 + $0x24] ss:$16 sps:$4 sm:$0xff]  }
 0x165   : > { %1022 = vmatprep.subr.bf16.mxu0 %v2041_v23  ;;  %v1817_v23 = vld [vmem:[%s2250_s2 + $0x28] ss:$16 sps:$4 sm:$0xff]  }
 0x166   : > { %1290 = vmatpush1.bf16.msra.mxu1 %v1796_v10 }
 0x167   : > { %1291 = vmatprep.subr.bf16.mxu1 %v1804_v12 }
 0x168   : > { %1023 = vmatpush2.bf16.msra.mxu0 %v2044_v24  ;;  %v1822_v24 = vld [vmem:[%s2250_s2 + $0x4] ss:$16 sps:$4 sm:$0xff]  }
 0x169   : > { %1024 = vmatprep.subr.bf16.mxu0 %v2053_v27  ;;  %v1823_v27 = vld [vmem:[%s2250_s2 + $0x8] ss:$16 sps:$4 sm:$0xff]  }
 0x16a   : > { %1292 = vmatpush1.bf16.msra.mxu1 %v1802_v14  ;;  %v1392_v14 = vlaneseq }
 0x16b   : > { %1293 = vmatprep.subr.bf16.mxu1 %v1810_v16 }
 0x16c   : > { %1025 = vmatpush2.bf16.msra.mxu0 %v2056_v28 }
 0x16d   : > { %1026 = vmatprep.subr.bf16.mxu0 %v2265_v44 }
 0x16e   : > { %1294 = vmatpush1.bf16.msra.mxu1 %v1808_v18 }
 0x16f   : > { %1295 = vmatprep.subr.bf16.mxu1 %v1816_v20 }
 0x170   : > { %1027 = vmatpush2.bf16.msra.mxu0 %v2266_v47 }
 0x171   : > { %1028 = vmatprep.subr.bf16.mxu0 %v2267_v48 }
 0x172   : > { %1296 = vmatpush1.bf16.msra.mxu1 %v1814_v22 }
 0x173   : > { %1297 = vmatprep.subr.bf16.mxu1 %v1822_v24 }
 0x174   : > { %1029 = vmatpush2.bf16.msra.mxu0 %v2268_v51 }
 0x175   : > { %1324 = vmatprep.subr.bf16.mxu0 %v1783_v59 }
 0x176   : > { %1298 = vmatpush1.bf16.msra.mxu1 %v1820_v26 }
 0x177   : > { %1031 = vmatmul.mubr.bf16.vlgmr.msra.gmra.mxu0 %v624_v32 }
 0x178   : > { %1356 = vmatprep.mubr.bf16.mxu0 %v2264_v38  ;;  %1325 = vmatpush1.bf16.msra.mxu0 %v1781_v56 }
 0x179   : > { %1326 = vmatprep.subr.bf16.mxu0 %v1789_v62 }
 0x17c   : > { %1327 = vmatpush1.bf16.msra.mxu0 %v1787_v2 }
 0x17d   : > { %1328 = vmatprep.subr.bf16.mxu0 %v1795_v4 }
 0x180   : > { %1329 = vmatpush1.bf16.msra.mxu0 %v1793_v7 }
 0x181   : > { %1330 = vmatprep.subr.bf16.mxu0 %v1801_v9 }
 0x184   : > { %1331 = vmatpush1.bf16.msra.mxu0 %v1799_v11 }
 0x185   : > { %1332 = vmatprep.subr.bf16.mxu0 %v1807_v13 }
 0x188   : > { %1333 = vmatpush1.bf16.msra.mxu0 %v1805_v15  ;;  %v1393_v15 = vshrl.u32 %v1392_v14, 7 }
 0x189   : > { %1334 = vmatprep.subr.bf16.mxu0 %v1813_v17 }
 0x18a   : > { %v1394_v17 = vsub.s32 0, %v1393_v15 }
 0x18c   : > { %1335 = vmatpush1.bf16.msra.mxu0 %v1811_v19 }
 0x18d   : > { %1336 = vmatprep.subr.bf16.mxu0 %v1819_v21 }
 0x190   : > { %1337 = vmatpush1.bf16.msra.mxu0 %v1817_v23 }
 0x191   : > { %1338 = vmatprep.subr.bf16.mxu0 %v1825_v25 }
 0x194   : > { %1339 = vmatpush1.bf16.msra.mxu0 %v1823_v27 }
 0x1f7   : > { %v991_v28 = vpop.f32.mrf.mxu0 }
 0x1f8   : > { %v950_v29 = vpop.f32.mrf.mxu1 }
 0x1f9   : > { %v992_v30 = vadd.f32 %v991_v28, %v950_v29  ;;  %v993_v31 = vpop.f32.mrf.mxu0 }
 0x1fa   : > { %v952_v32 = vpop.f32.mrf.mxu1 }
 0x1fb   : > { %v995_v33 = vpop.f32.mrf.mxu0  ;;  %v994_v57 = vadd.f32 %v993_v31, %v952_v32 }
 0x1fc   : > { %v954_v34 = vpop.f32.mrf.mxu1 }
 0x1fd   : > { %v996_v35 = vpop.f32.mrf.mxu0 }
 0x1fe   : > { %v955_v36 = vpop.f32.mrf.mxu1 }
 0x218   : > { %v1073_v40 = vpop.f32.mrf.mxu1 }
 0x21a   : > { %v1075_v41 = vpop.f32.mrf.mxu1 }
 0x21c   : > { %v1077_v45 = vpop.f32.mrf.mxu1 }
 0x21e   : > { %v1078_v49 = vpop.f32.mrf.mxu1 }
 0x237   : > { %v1032_v50 = vpop.f32.mrf.mxu0 }
 0x238   : > { %v1074_v53 = vadd.f32 %v1073_v40, %v1032_v50 }
 0x239   : > { %v1034_v54 = vpop.f32.mrf.mxu0 }
 0x23a   : > { %v1076_v58 = vadd.f32 %v1075_v41, %v1034_v54  ;;  %v1081_v63 = vmax.f32 %v992_v30, %v1074_v53 }
 0x23b   : > { %v1036_v61 = vpop.f32.mrf.mxu0 }
 0x23c   : > { %v1082_v39 = vmax.f32 %v994_v57, %v1076_v58 }
 0x23d   : > { %v1037_v6 = vpop.f32.mrf.mxu0 }
 0x23e   : > { %v1083_v42 = vmax.f32 %v1081_v63, %v1082_v39 }
 0x240   : > { %v1088_v46 = vadd.f32 %v1571_v37, %v1083_v42 }
 0x242   : > { %v1089_v38 = vmax.f32 %v1088_v46, 0.0 }
 0x244   : > { %v1090_v0 = vpack.c.bf16 %v1089_v38, %v1089_v38 }
 0x246   : > { %1316 = vmatmul.mubr.bf16.vlgmr.msra.gmra.mxu1 %v1090_v0  ;;  %1357 = vmatmul.mubr.bf16.vlgmr.msra.gmra.mxu0 %v1090_v0 }
 0x306   : > { %v1317_v43 = vpop.f32.mrf.mxu1  ;;  %v1358_v44 = vpop.f32.mrf.mxu0 }
 0x307   : > { %v1370_v56 = vrot.slane %v1358_v44, 2 }
 0x308   : > { %v1319_v47 = vpop.f32.mrf.mxu1  ;;  %v1360_v48 = vpop.f32.mrf.mxu0 }
 0x309   : > { %v1366_v51 = vrot.slane %v1319_v47, 1  ;;  %v1374_v2 = vrot.slane %v1360_v48, 3 }
 0x30a   : > { %v1321_v52 = vpop.f32.mrf.mxu1  ;;  %v1362_v55 = vpop.f32.mrf.mxu0 }
 0x30b   : > { %v1368_v59 = vadd.f32 %v1366_v51, %v1317_v43 }
 0x30c   : > { %v1322_v60 = vpop.f32.mrf.mxu1  ;;  %v1363_v62 = vpop.f32.mrf.mxu0 }
 0x30d   : > { %v1372_v1 = vadd.f32 %v1370_v56, %v1368_v59 }
 0x30f   : > { %v1376_v4 = vadd.f32 %v1374_v2, %v1372_v1 }
 0x311   : > { %v1378_v5 = vadd.f32 %v1377_v3, %v1376_v4 }
 0x313   : > { %v1380_v7 = vsel %vm1379_vm0, %v1378_v5, -inf }
 0x314   : > { %1381 = vmax.xlane.f32.xlu0 %v1380_v7 }
 0x39d   : > { %v1382_v8 = vpop.xlane.xlu0 %1381 }
 0x39e   : > { %v1383_v9 = vsub.f32 %v1378_v5, %v1382_v8 }
 0x3a0   : > { %v1384_v10 = vmul.f32 1.442695, %v1383_v9 }
 0x3a2   : > { %1826 = vpow2.f32 %v1384_v10 }
 0x3af   : > { %v1827_v11 = vpop.eup %1826 }
 0x3b0   : > { %v1386_v12 = vsel %vm1379_vm0, %v1827_v11, 0.0 }
 0x3b1   : > { %1387 = vadd.xlane.f32.xlu0 %v1386_v12 }
 0x43a   : > { %v1388_v13 = vpop.xlane.xlu0 %1387 }
 0x43b   : > { %1828 = vlog2.f32 %v1388_v13 }
 0x448   : > { %v1829_v16 = vpop.eup %1828 }
 0x449   : > { %v1390_v18 = vmul.f32 0.6931472, %v1829_v16 }
 0x44b   : > { %v1391_v19 = vsub.f32 %v1383_v9, %v1390_v18 }
 0x44d   : > { %v1395_v20 = vrot.slane %v1391_v19, %v1394_v17 }
 0x44f   : > { %1396 = vst [vmem:[%s210_s30] sm:$0xff] %v1395_v20 }
 0x450 PF: > { %s15_s15 = sadd.s32 1, %s1866_s15  }
 0x451   : > { %p12_p1 = scmp.ge.s32.totalorder %s15_s15, 4  }
 0x453   :  { %14 = sbr.rel (!%p12_p1) target bundleno = 1 (0x1), region = 72 }
 0x458   :  { %1416 = vsyncpa [#allocation4], 1 }
 0x459   :  { %1418 = vsyncpa [#allocation4 + $0x1], 1 }

</bundles_post_ra>
